<compile_context>
chip_gen: v7x
topology: tpu7x:2x2x1
jax: 0.10.0
libtpu: 0.0.40
codegen_flags: <defaults>
</compile_context>

<pallas_src>
import functools

import jax
import jax.numpy as jnp
import numpy as np
from jax.experimental import pallas as pl
from jax.experimental.pallas import tpu as pltpu


def _conv3x3_flat(xf, w_ref, b_ref, *, width, hw):
    """3x3 same-padding conv on a (C_in, H*W) activation (spatial in the lane dim).

    xf:    (C_in, H*W) float32, spatial flattened row-major.
    w_ref: (9, C_out, C_in) ref; tap k = kh*3 + kw holds weight[:, :, kh, kw].
    b_ref: (C_out, 1) ref (float32 bias).
    """
    c_in = xf.shape[0]
    c_out = w_ref.shape[1]

    # 128-lane-aligned zero halo: each tap below is a static lane-offset slice of
    # `xe`.  Out-of-image rows land in the halo zeros; out-of-image columns (row
    # wrap-around of the flat index) are masked explicitly.
    halo = 128
    zeros = jnp.zeros((c_in, halo), xf.dtype)
    xe = jnp.concatenate([zeros, xf, zeros], axis=1)            # (C_in, H*W + 256)

    col = jax.lax.broadcasted_iota(jnp.int32, (c_in, hw), 1) % width

    # Bias-initialized f32 accumulator (no separate bias-add pass).
    acc = jnp.broadcast_to(b_ref[...], (c_out, hw))

    for k in range(9):
        sh = k // 3 - 1
        sw = k % 3 - 1
        s = sh * width + sw
        t = xe[:, halo + s:halo + s + hw]                       # (C_in, H*W)
        if sw > 0:
            t = jnp.where(col < width - sw, t, 0.0)
        elif sw < 0:
            t = jnp.where(col >= -sw, t, 0.0)
        acc = acc + jnp.dot(w_ref[k].astype(jnp.bfloat16), t.astype(jnp.bfloat16),
                            preferred_element_type=jnp.float32)
    return acc


def _hin_res_block_kernel(x_ref, w1_ref, b1_ref, w2_ref, b2_ref, gamma_ref, beta_ref,
                          o_ref, *, width, relu_slope, eps, norm_channels):
    _, channels, hw = x_ref.shape

    x = x_ref[0].astype(jnp.float32)                            # (C, H*W), lane-dense

    # conv_1 + LeakyReLU
    pre1 = _conv3x3_flat(x, w1_ref, b1_ref, width=width, hw=hw)
    r1 = jnp.maximum(pre1, relu_slope * pre1)

    # Half Instance Norm: normalize the first C//2 channels (biased variance over
    # H*W, eps, affine) and pass the second half through.  Implemented as a
    # per-channel scale/shift so no channel split + concat is needed.
    mean = jnp.mean(r1, axis=1, keepdims=True)                  # (C, 1)
    cent = r1 - mean
    var = jnp.mean(cent * cent, axis=1, keepdims=True)          # (C, 1), biased
    inv = jax.lax.rsqrt(var + eps)
    ch_idx = jax.lax.broadcasted_iota(jnp.int32, (channels, 1), 0)
    is_norm = ch_idx < norm_channels
    gamma_v = gamma_ref[...]                                    # (C, 1); 2nd half unused
    beta_v = beta_ref[...]
    scale = jnp.where(is_norm, gamma_v * inv, jnp.ones_like(inv))
    shift = jnp.where(is_norm, beta_v - mean * gamma_v * inv, jnp.zeros_like(inv))
    r2 = r1 * scale + shift

    # conv_2 + LeakyReLU
    pre2 = _conv3x3_flat(r2, w2_ref, b2_ref, width=width, hw=hw)
    r3 = jnp.maximum(pre2, relu_slope * pre2)

    # residual
    o_ref[0] = (x + r3).astype(o_ref.dtype)


def hin_res_block(x, params, *, relu_slope=0.2, eps=1e-5):
    """x: (B, C, H, W) float32 (NCHW, like the PyTorch module).  Returns (B, C, H, W)."""
    w1, b1, w2, b2, gamma, beta = params
    B, C, H, W = x.shape
    HW = H * W
    half = C // 2
    assert C % 2 == 0, "use_HIN needs an even channel count"
    assert HW % 128 == 0, "flattened spatial dim should be a multiple of 128 lanes"

    # NCHW is already channel-major: flattening (H, W) into the lane dim is a free
    # reshape -- no transpose / HBM round trip.
    xf = x.reshape(B, C, HW)

    # Repack conv weights (C_out, C_in, 3, 3) -> (9, C_out, C_in), tap k = kh*3 + kw.
    w1_taps = jnp.transpose(w1, (2, 3, 0, 1)).reshape(9, C, C)
    w2_taps = jnp.transpose(w2, (2, 3, 0, 1)).reshape(9, C, C)
    b1_col = b1.reshape(C, 1)
    b2_col = b2.reshape(C, 1)
    # Affine params padded to all C channels (second half is ignored in-kernel).
    gamma_full = jnp.concatenate([gamma, jnp.ones((C - half,), gamma.dtype)]).reshape(C, 1)
    beta_full = jnp.concatenate([beta, jnp.zeros((C - half,), beta.dtype)]).reshape(C, 1)

    kernel = functools.partial(_hin_res_block_kernel, width=W, relu_slope=relu_slope,
                               eps=eps, norm_channels=half)

    out_flat = pl.pallas_call(
        kernel,
        out_shape=jax.ShapeDtypeStruct((B, C, HW), x.dtype),
        grid_spec=pltpu.PrefetchScalarGridSpec(
            num_scalar_prefetch=0,
            grid=(B,),
            in_specs=[
                pl.BlockSpec((1, C, HW), lambda b: (b, 0, 0)),   # x (per image)
                pl.BlockSpec((9, C, C), lambda b: (0, 0, 0)),    # conv_1 taps
                pl.BlockSpec((C, 1), lambda b: (0, 0)),          # conv_1 bias
                pl.BlockSpec((9, C, C), lambda b: (0, 0, 0)),    # conv_2 taps
                pl.BlockSpec((C, 1), lambda b: (0, 0)),          # conv_2 bias
                pl.BlockSpec((C, 1), lambda b: (0, 0)),          # HIN gamma
                pl.BlockSpec((C, 1), lambda b: (0, 0)),          # HIN beta
            ],
            out_specs=pl.BlockSpec((1, C, HW), lambda b: (b, 0, 0)),
        ),
        compiler_params=pltpu.CompilerParams(
            dimension_semantics=("parallel",),
            # Per-step working set is a few KiB now that the padded scratch is gone;
            # an explicit limit keeps us well inside v7x's 64 MiB (and v5e/v6e).
            vmem_limit_bytes=32 * 1024 * 1024,
        ),
    )(xf, w1_taps, b1_col, w2_taps, b2_col, gamma_full, beta_full)

    return out_flat.reshape(B, C, H, W)


def hin_res_block_ref(x, params, *, relu_slope=0.2, eps=1e-5):
    """Plain-JAX reference (matches the kernel's bf16-input / f32-accumulate convs)."""
    w1, b1, w2, b2, gamma, beta = params

    def conv3x3(v, w, b):
        y = jax.lax.conv_general_dilated(
            v.astype(jnp.bfloat16), w.astype(jnp.bfloat16),
            window_strides=(1, 1), padding=((1, 1), (1, 1)),
            dimension_numbers=("NCHW", "OIHW", "NCHW"),
            preferred_element_type=jnp.float32)
        return y + b.reshape(1, -1, 1, 1)

    def lrelu(v):
        return jnp.maximum(v, relu_slope * v)

    r1 = lrelu(conv3x3(x, w1, b1))
    a, rest = jnp.split(r1, 2, axis=1)
    mean = jnp.mean(a, axis=(2, 3), keepdims=True)
    var = jnp.mean((a - mean) ** 2, axis=(2, 3), keepdims=True)
    a = (a - mean) * jax.lax.rsqrt(var + eps)
    a = a * gamma.reshape(1, -1, 1, 1) + beta.reshape(1, -1, 1, 1)
    r2 = jnp.concatenate([a, rest], axis=1)
    r3 = lrelu(conv3x3(r2, w2, b2))
    return x + r3


def make_params(key, channels):
    """Deterministic params matching the PyTorch module's shapes (bias=True, affine=True)."""
    half = channels // 2
    ks = jax.random.split(key, 6)
    w1 = 0.1 * jax.random.normal(ks[0], (channels, channels, 3, 3), jnp.float32)
    b1 = 0.1 * jax.random.normal(ks[1], (channels,), jnp.float32)
    w2 = 0.1 * jax.random.normal(ks[2], (channels, channels, 3, 3), jnp.float32)
    b2 = 0.1 * jax.random.normal(ks[3], (channels,), jnp.float32)
    gamma = 1.0 + 0.1 * jax.random.normal(ks[4], (half,), jnp.float32)
    beta = 0.1 * jax.random.normal(ks[5], (half,), jnp.float32)
    return (w1, b1, w2, b2, gamma, beta)


if __name__ == "__main__":
    B, C, H, W = 2, 4, 16, 16

    key = jax.random.PRNGKey(0)
    kx, kp = jax.random.split(key)
    x = jax.random.normal(kx, (B, C, H, W), jnp.float32)        # NCHW like PyTorch
    params = make_params(kp, C)

    out = hin_res_block(x, params)
    jax.block_until_ready(out)
    assert out.shape == (B, C, H, W), out.shape

    ref = hin_res_block_ref(x, params)
    np.testing.assert_allclose(np.asarray(out), np.asarray(ref), rtol=2e-2, atol=2e-2)
    print("KERNEL_OK")
</pallas_src>

<mosaic_0001>
module attributes {stable_mosaic.version = 11 : i64} {
  func.func @_hin_res_block_kernel(%arg0: i32, %arg1: memref<1x4x256xf32, #tpu.memory_space<vmem>>, %arg2: memref<9x4x4xf32, #tpu.memory_space<vmem>>, %arg3: memref<4x1xf32, #tpu.memory_space<vmem>>, %arg4: memref<9x4x4xf32, #tpu.memory_space<vmem>>, %arg5: memref<4x1xf32, #tpu.memory_space<vmem>>, %arg6: memref<4x1xf32, #tpu.memory_space<vmem>>, %arg7: memref<4x1xf32, #tpu.memory_space<vmem>>, %arg8: memref<1x4x256xf32, #tpu.memory_space<vmem>>) attributes {dimension_semantics = [#tpu.dimension_semantics<parallel>], iteration_bounds = array<i64: 2>, scalar_prefetch = 0 : i64, scratch_operands = 0 : i64, tpu.core_type = #tpu.core_type<tc>, window_params = [{transform_indices = @transform_0, window_bounds = array<i64: 1, 4, 256>}, {pipeline_mode = #tpu.pipeline_mode<synchronous>, transform_indices = @transform_1, window_bounds = array<i64: 9, 4, 4>}, {pipeline_mode = #tpu.pipeline_mode<synchronous>, transform_indices = @transform_2, window_bounds = array<i64: 4, 1>}, {pipeline_mode = #tpu.pipeline_mode<synchronous>, transform_indices = @transform_3, window_bounds = array<i64: 9, 4, 4>}, {pipeline_mode = #tpu.pipeline_mode<synchronous>, transform_indices = @transform_4, window_bounds = array<i64: 4, 1>}, {pipeline_mode = #tpu.pipeline_mode<synchronous>, transform_indices = @transform_5, window_bounds = array<i64: 4, 1>}, {pipeline_mode = #tpu.pipeline_mode<synchronous>, transform_indices = @transform_6, window_bounds = array<i64: 4, 1>}, {transform_indices = @transform_7, window_bounds = array<i64: 1, 4, 256>}]} {
    %c0 = arith.constant 0 : index
    %c0_0 = arith.constant 0 : index
    %c0_1 = arith.constant 0 : index
    %0 = vector.load %arg1[%c0, %c0_0, %c0_1] : memref<1x4x256xf32, #tpu.memory_space<vmem>>, vector<1x4x256xf32>
    %1 = vector.shape_cast %0 : vector<1x4x256xf32> to vector<4x256xf32>
    %cst = arith.constant 0.000000e+00 : f32
    %2 = vector.broadcast %cst : f32 to vector<4x128xf32>
    %3 = tpu.concatenate %2, %1, %2 in 1 : vector<4x128xf32>, vector<4x256xf32>, vector<4x128xf32> -> vector<4x512xf32>
    %4 = tpu.iota {dimensions = array<i32: 1>} : vector<4x256xi32>
    %c16_i32 = arith.constant 16 : i32
    %c0_i32 = arith.constant 0 : i32
    %5 = arith.cmpi eq, %c16_i32, %c0_i32 : i32
    %c1_i32 = arith.constant 1 : i32
    %6 = arith.select %5, %c1_i32, %c16_i32 : i32
    %7 = vector.broadcast %6 : i32 to vector<4x256xi32>
    %8 = arith.remsi %4, %7 : vector<4x256xi32>
    %c0_i32_2 = arith.constant 0 : i32
    %9 = vector.broadcast %c0_i32_2 : i32 to vector<4x256xi32>
    %10 = arith.cmpi ne, %8, %9 : vector<4x256xi32>
    %c0_i32_3 = arith.constant 0 : i32
    %11 = vector.broadcast %c0_i32_3 : i32 to vector<4x256xi32>
    %12 = arith.cmpi slt, %8, %11 : vector<4x256xi32>
    %c0_i32_4 = arith.constant 0 : i32
    %13 = arith.cmpi slt, %6, %c0_i32_4 : i32
    %14 = vector.broadcast %13 : i1 to vector<4x256xi1>
    %15 = vector.broadcast %14 : vector<4x256xi1> to vector<4x256xi1>
    %16 = arith.xori %12, %15 : vector<4x256xi1>
    %17 = arith.andi %16, %10 : vector<4x256xi1>
    %18 = vector.broadcast %6 : i32 to vector<4x256xi32>
    %19 = arith.addi %8, %18 : vector<4x256xi32>
    %20 = arith.select %17, %19, %8 : vector<4x256xi1>, vector<4x256xi32>
    %c0_5 = arith.constant 0 : index
    %c0_6 = arith.constant 0 : index
    %21 = vector.load %arg3[%c0_5, %c0_6] : memref<4x1xf32, #tpu.memory_space<vmem>>, vector<4x1xf32>
    %22 = vector.shape_cast %21 : vector<4x1xf32> to vector<4x1xf32>
    %23 = vector.broadcast %22 : vector<4x1xf32> to vector<4x256xf32>
    %24 = vector.extract_strided_slice %3 {offsets = [0, 111], sizes = [4, 256], strides = [1, 1]} : vector<4x512xf32> to vector<4x256xf32>
    %c1_i32_7 = arith.constant 1 : i32
    %25 = vector.broadcast %c1_i32_7 : i32 to vector<4x256xi32>
    %26 = arith.cmpi sge, %20, %25 : vector<4x256xi32>
    %cst_8 = arith.constant 0.000000e+00 : f32
    %27 = vector.broadcast %cst_8 : f32 to vector<4x256xf32>
    %28 = arith.select %26, %24, %27 : vector<4x256xi1>, vector<4x256xf32>
    %c0_9 = arith.constant 0 : index
    %c0_10 = arith.constant 0 : index
    %c0_11 = arith.constant 0 : index
    %29 = vector.load %arg2[%c0_9, %c0_10, %c0_11] : memref<9x4x4xf32, #tpu.memory_space<vmem>>, vector<1x4x4xf32>
    %30 = vector.shape_cast %29 : vector<1x4x4xf32> to vector<4x4xf32>
    %31 = arith.truncf %30 : vector<4x4xf32> to vector<4x4xbf16>
    %32 = arith.truncf %28 : vector<4x256xf32> to vector<4x256xbf16>
    %cst_12 = arith.constant dense<0.000000e+00> : vector<4x256xf32>
    %33 = tpu.matmul %31, %32, %cst_12 {dimension_numbers = #tpu.dot_dimension_numbers<[1], [0], [0], [1], [0, 0, 1, 1], [], []>} : vector<4x4xbf16>, vector<4x256xbf16>, vector<4x256xf32> -> vector<4x256xf32>
    %34 = arith.addf %23, %33 : vector<4x256xf32>
    %35 = vector.extract_strided_slice %3 {offsets = [0, 112], sizes = [4, 256], strides = [1, 1]} : vector<4x512xf32> to vector<4x256xf32>
    %c1 = arith.constant 1 : index
    %c0_13 = arith.constant 0 : index
    %c0_14 = arith.constant 0 : index
    %36 = vector.load %arg2[%c1, %c0_13, %c0_14] : memref<9x4x4xf32, #tpu.memory_space<vmem>>, vector<1x4x4xf32>
    %37 = vector.shape_cast %36 : vector<1x4x4xf32> to vector<4x4xf32>
    %38 = arith.truncf %37 : vector<4x4xf32> to vector<4x4xbf16>
    %39 = arith.truncf %35 : vector<4x256xf32> to vector<4x256xbf16>
    %cst_15 = arith.constant dense<0.000000e+00> : vector<4x256xf32>
    %40 = tpu.matmul %38, %39, %cst_15 {dimension_numbers = #tpu.dot_dimension_numbers<[1], [0], [0], [1], [0, 0, 1, 1], [], []>} : vector<4x4xbf16>, vector<4x256xbf16>, vector<4x256xf32> -> vector<4x256xf32>
    %41 = arith.addf %34, %40 : vector<4x256xf32>
    %42 = vector.extract_strided_slice %3 {offsets = [0, 113], sizes = [4, 256], strides = [1, 1]} : vector<4x512xf32> to vector<4x256xf32>
    %c15_i32 = arith.constant 15 : i32
    %43 = vector.broadcast %c15_i32 : i32 to vector<4x256xi32>
    %44 = arith.cmpi slt, %20, %43 : vector<4x256xi32>
    %cst_16 = arith.constant 0.000000e+00 : f32
    %45 = vector.broadcast %cst_16 : f32 to vector<4x256xf32>
    %46 = arith.select %44, %42, %45 : vector<4x256xi1>, vector<4x256xf32>
    %c2 = arith.constant 2 : index
    %c0_17 = arith.constant 0 : index
    %c0_18 = arith.constant 0 : index
    %47 = vector.load %arg2[%c2, %c0_17, %c0_18] : memref<9x4x4xf32, #tpu.memory_space<vmem>>, vector<1x4x4xf32>
    %48 = vector.shape_cast %47 : vector<1x4x4xf32> to vector<4x4xf32>
    %49 = arith.truncf %48 : vector<4x4xf32> to vector<4x4xbf16>
    %50 = arith.truncf %46 : vector<4x256xf32> to vector<4x256xbf16>
    %cst_19 = arith.constant dense<0.000000e+00> : vector<4x256xf32>
    %51 = tpu.matmul %49, %50, %cst_19 {dimension_numbers = #tpu.dot_dimension_numbers<[1], [0], [0], [1], [0, 0, 1, 1], [], []>} : vector<4x4xbf16>, vector<4x256xbf16>, vector<4x256xf32> -> vector<4x256xf32>
    %52 = arith.addf %41, %51 : vector<4x256xf32>
    %53 = vector.extract_strided_slice %3 {offsets = [0, 127], sizes = [4, 256], strides = [1, 1]} : vector<4x512xf32> to vector<4x256xf32>
    %c1_i32_20 = arith.constant 1 : i32
    %54 = vector.broadcast %c1_i32_20 : i32 to vector<4x256xi32>
    %55 = arith.cmpi sge, %20, %54 : vector<4x256xi32>
    %cst_21 = arith.constant 0.000000e+00 : f32
    %56 = vector.broadcast %cst_21 : f32 to vector<4x256xf32>
    %57 = arith.select %55, %53, %56 : vector<4x256xi1>, vector<4x256xf32>
    %c3 = arith.constant 3 : index
    %c0_22 = arith.constant 0 : index
    %c0_23 = arith.constant 0 : index
    %58 = vector.load %arg2[%c3, %c0_22, %c0_23] : memref<9x4x4xf32, #tpu.memory_space<vmem>>, vector<1x4x4xf32>
    %59 = vector.shape_cast %58 : vector<1x4x4xf32> to vector<4x4xf32>
    %60 = arith.truncf %59 : vector<4x4xf32> to vector<4x4xbf16>
    %61 = arith.truncf %57 : vector<4x256xf32> to vector<4x256xbf16>
    %cst_24 = arith.constant dense<0.000000e+00> : vector<4x256xf32>
    %62 = tpu.matmul %60, %61, %cst_24 {dimension_numbers = #tpu.dot_dimension_numbers<[1], [0], [0], [1], [0, 0, 1, 1], [], []>} : vector<4x4xbf16>, vector<4x256xbf16>, vector<4x256xf32> -> vector<4x256xf32>
    %63 = arith.addf %52, %62 : vector<4x256xf32>
    %64 = vector.extract_strided_slice %3 {offsets = [0, 128], sizes = [4, 256], strides = [1, 1]} : vector<4x512xf32> to vector<4x256xf32>
    %c4 = arith.constant 4 : index
    %c0_25 = arith.constant 0 : index
    %c0_26 = arith.constant 0 : index
    %65 = vector.load %arg2[%c4, %c0_25, %c0_26] : memref<9x4x4xf32, #tpu.memory_space<vmem>>, vector<1x4x4xf32>
    %66 = vector.shape_cast %65 : vector<1x4x4xf32> to vector<4x4xf32>
    %67 = arith.truncf %66 : vector<4x4xf32> to vector<4x4xbf16>
    %68 = arith.truncf %64 : vector<4x256xf32> to vector<4x256xbf16>
    %cst_27 = arith.constant dense<0.000000e+00> : vector<4x256xf32>
    %69 = tpu.matmul %67, %68, %cst_27 {dimension_numbers = #tpu.dot_dimension_numbers<[1], [0], [0], [1], [0, 0, 1, 1], [], []>} : vector<4x4xbf16>, vector<4x256xbf16>, vector<4x256xf32> -> vector<4x256xf32>
    %70 = arith.addf %63, %69 : vector<4x256xf32>
    %71 = vector.extract_strided_slice %3 {offsets = [0, 129], sizes = [4, 256], strides = [1, 1]} : vector<4x512xf32> to vector<4x256xf32>
    %c15_i32_28 = arith.constant 15 : i32
    %72 = vector.broadcast %c15_i32_28 : i32 to vector<4x256xi32>
    %73 = arith.cmpi slt, %20, %72 : vector<4x256xi32>
    %cst_29 = arith.constant 0.000000e+00 : f32
    %74 = vector.broadcast %cst_29 : f32 to vector<4x256xf32>
    %75 = arith.select %73, %71, %74 : vector<4x256xi1>, vector<4x256xf32>
    %c5 = arith.constant 5 : index
    %c0_30 = arith.constant 0 : index
    %c0_31 = arith.constant 0 : index
    %76 = vector.load %arg2[%c5, %c0_30, %c0_31] : memref<9x4x4xf32, #tpu.memory_space<vmem>>, vector<1x4x4xf32>
    %77 = vector.shape_cast %76 : vector<1x4x4xf32> to vector<4x4xf32>
    %78 = arith.truncf %77 : vector<4x4xf32> to vector<4x4xbf16>
    %79 = arith.truncf %75 : vector<4x256xf32> to vector<4x256xbf16>
    %cst_32 = arith.constant dense<0.000000e+00> : vector<4x256xf32>
    %80 = tpu.matmul %78, %79, %cst_32 {dimension_numbers = #tpu.dot_dimension_numbers<[1], [0], [0], [1], [0, 0, 1, 1], [], []>} : vector<4x4xbf16>, vector<4x256xbf16>, vector<4x256xf32> -> vector<4x256xf32>
    %81 = arith.addf %70, %80 : vector<4x256xf32>
    %82 = vector.extract_strided_slice %3 {offsets = [0, 143], sizes = [4, 256], strides = [1, 1]} : vector<4x512xf32> to vector<4x256xf32>
    %c1_i32_33 = arith.constant 1 : i32
    %83 = vector.broadcast %c1_i32_33 : i32 to vector<4x256xi32>
    %84 = arith.cmpi sge, %20, %83 : vector<4x256xi32>
    %cst_34 = arith.constant 0.000000e+00 : f32
    %85 = vector.broadcast %cst_34 : f32 to vector<4x256xf32>
    %86 = arith.select %84, %82, %85 : vector<4x256xi1>, vector<4x256xf32>
    %c6 = arith.constant 6 : index
    %c0_35 = arith.constant 0 : index
    %c0_36 = arith.constant 0 : index
    %87 = vector.load %arg2[%c6, %c0_35, %c0_36] : memref<9x4x4xf32, #tpu.memory_space<vmem>>, vector<1x4x4xf32>
    %88 = vector.shape_cast %87 : vector<1x4x4xf32> to vector<4x4xf32>
    %89 = arith.truncf %88 : vector<4x4xf32> to vector<4x4xbf16>
    %90 = arith.truncf %86 : vector<4x256xf32> to vector<4x256xbf16>
    %cst_37 = arith.constant dense<0.000000e+00> : vector<4x256xf32>
    %91 = tpu.matmul %89, %90, %cst_37 {dimension_numbers = #tpu.dot_dimension_numbers<[1], [0], [0], [1], [0, 0, 1, 1], [], []>} : vector<4x4xbf16>, vector<4x256xbf16>, vector<4x256xf32> -> vector<4x256xf32>
    %92 = arith.addf %81, %91 : vector<4x256xf32>
    %93 = vector.extract_strided_slice %3 {offsets = [0, 144], sizes = [4, 256], strides = [1, 1]} : vector<4x512xf32> to vector<4x256xf32>
    %c7 = arith.constant 7 : index
    %c0_38 = arith.constant 0 : index
    %c0_39 = arith.constant 0 : index
    %94 = vector.load %arg2[%c7, %c0_38, %c0_39] : memref<9x4x4xf32, #tpu.memory_space<vmem>>, vector<1x4x4xf32>
    %95 = vector.shape_cast %94 : vector<1x4x4xf32> to vector<4x4xf32>
    %96 = arith.truncf %95 : vector<4x4xf32> to vector<4x4xbf16>
    %97 = arith.truncf %93 : vector<4x256xf32> to vector<4x256xbf16>
    %cst_40 = arith.constant dense<0.000000e+00> : vector<4x256xf32>
    %98 = tpu.matmul %96, %97, %cst_40 {dimension_numbers = #tpu.dot_dimension_numbers<[1], [0], [0], [1], [0, 0, 1, 1], [], []>} : vector<4x4xbf16>, vector<4x256xbf16>, vector<4x256xf32> -> vector<4x256xf32>
    %99 = arith.addf %92, %98 : vector<4x256xf32>
    %100 = vector.extract_strided_slice %3 {offsets = [0, 145], sizes = [4, 256], strides = [1, 1]} : vector<4x512xf32> to vector<4x256xf32>
    %c15_i32_41 = arith.constant 15 : i32
    %101 = vector.broadcast %c15_i32_41 : i32 to vector<4x256xi32>
    %102 = arith.cmpi slt, %20, %101 : vector<4x256xi32>
    %cst_42 = arith.constant 0.000000e+00 : f32
    %103 = vector.broadcast %cst_42 : f32 to vector<4x256xf32>
    %104 = arith.select %102, %100, %103 : vector<4x256xi1>, vector<4x256xf32>
    %c8 = arith.constant 8 : index
    %c0_43 = arith.constant 0 : index
    %c0_44 = arith.constant 0 : index
    %105 = vector.load %arg2[%c8, %c0_43, %c0_44] : memref<9x4x4xf32, #tpu.memory_space<vmem>>, vector<1x4x4xf32>
    %106 = vector.shape_cast %105 : vector<1x4x4xf32> to vector<4x4xf32>
    %107 = arith.truncf %106 : vector<4x4xf32> to vector<4x4xbf16>
    %108 = arith.truncf %104 : vector<4x256xf32> to vector<4x256xbf16>
    %cst_45 = arith.constant dense<0.000000e+00> : vector<4x256xf32>
    %109 = tpu.matmul %107, %108, %cst_45 {dimension_numbers = #tpu.dot_dimension_numbers<[1], [0], [0], [1], [0, 0, 1, 1], [], []>} : vector<4x4xbf16>, vector<4x256xbf16>, vector<4x256xf32> -> vector<4x256xf32>
    %110 = arith.addf %99, %109 : vector<4x256xf32>
    %cst_46 = arith.constant 2.000000e-01 : f32
    %111 = vector.broadcast %cst_46 : f32 to vector<4x256xf32>
    %112 = arith.mulf %111, %110 : vector<4x256xf32>
    %113 = arith.maximumf %110, %112 : vector<4x256xf32>
    %cst_47 = arith.constant dense<0.000000e+00> : vector<4xf32>
    %114 = vector.multi_reduction <add>, %113, %cst_47 [1] : vector<4x256xf32> to vector<4xf32>
    %115 = vector.shape_cast %114 : vector<4xf32> to vector<4x1xf32>
    %cst_48 = arith.constant 2.560000e+02 : f32
    %116 = vector.broadcast %cst_48 : f32 to vector<4x1xf32>
    %117 = arith.divf %115, %116 : vector<4x1xf32>
    %118 = vector.broadcast %117 : vector<4x1xf32> to vector<4x256xf32>
    %119 = arith.subf %113, %118 : vector<4x256xf32>
    %120 = arith.mulf %119, %119 : vector<4x256xf32>
    %cst_49 = arith.constant dense<0.000000e+00> : vector<4xf32>
    %121 = vector.multi_reduction <add>, %120, %cst_49 [1] : vector<4x256xf32> to vector<4xf32>
    %122 = vector.shape_cast %121 : vector<4xf32> to vector<4x1xf32>
    %cst_50 = arith.constant 2.560000e+02 : f32
    %123 = vector.broadcast %cst_50 : f32 to vector<4x1xf32>
    %124 = arith.divf %122, %123 : vector<4x1xf32>
    %cst_51 = arith.constant 9.99999974E-6 : f32
    %125 = vector.broadcast %cst_51 : f32 to vector<4x1xf32>
    %126 = arith.addf %124, %125 : vector<4x1xf32>
    %127 = math.rsqrt %126 : vector<4x1xf32>
    %128 = tpu.iota {dimensions = array<i32: 0>} : vector<4x1xi32>
    %c2_i32 = arith.constant 2 : i32
    %129 = vector.broadcast %c2_i32 : i32 to vector<4x1xi32>
    %130 = arith.cmpi slt, %128, %129 : vector<4x1xi32>
    %c0_52 = arith.constant 0 : index
    %c0_53 = arith.constant 0 : index
    %131 = vector.load %arg6[%c0_52, %c0_53] : memref<4x1xf32, #tpu.memory_space<vmem>>, vector<4x1xf32>
    %c0_54 = arith.constant 0 : index
    %c0_55 = arith.constant 0 : index
    %132 = vector.load %arg7[%c0_54, %c0_55] : memref<4x1xf32, #tpu.memory_space<vmem>>, vector<4x1xf32>
    %133 = arith.mulf %131, %127 : vector<4x1xf32>
    %cst_56 = arith.constant 1.000000e+00 : f32
    %134 = vector.broadcast %cst_56 : f32 to vector<4x1xf32>
    %135 = arith.select %130, %133, %134 : vector<4x1xi1>, vector<4x1xf32>
    %136 = arith.mulf %117, %131 : vector<4x1xf32>
    %137 = arith.mulf %136, %127 : vector<4x1xf32>
    %138 = arith.subf %132, %137 : vector<4x1xf32>
    %cst_57 = arith.constant 0.000000e+00 : f32
    %139 = vector.broadcast %cst_57 : f32 to vector<4x1xf32>
    %140 = arith.select %130, %138, %139 : vector<4x1xi1>, vector<4x1xf32>
    %141 = vector.broadcast %135 : vector<4x1xf32> to vector<4x256xf32>
    %142 = arith.mulf %113, %141 : vector<4x256xf32>
    %143 = vector.broadcast %140 : vector<4x1xf32> to vector<4x256xf32>
    %144 = arith.addf %142, %143 : vector<4x256xf32>
    %cst_58 = arith.constant 0.000000e+00 : f32
    %145 = vector.broadcast %cst_58 : f32 to vector<4x128xf32>
    %146 = tpu.concatenate %145, %144, %145 in 1 : vector<4x128xf32>, vector<4x256xf32>, vector<4x128xf32> -> vector<4x512xf32>
    %147 = tpu.iota {dimensions = array<i32: 1>} : vector<4x256xi32>
    %c16_i32_59 = arith.constant 16 : i32
    %c0_i32_60 = arith.constant 0 : i32
    %148 = arith.cmpi eq, %c16_i32_59, %c0_i32_60 : i32
    %c1_i32_61 = arith.constant 1 : i32
    %149 = arith.select %148, %c1_i32_61, %c16_i32_59 : i32
    %150 = vector.broadcast %149 : i32 to vector<4x256xi32>
    %151 = arith.remsi %147, %150 : vector<4x256xi32>
    %c0_i32_62 = arith.constant 0 : i32
    %152 = vector.broadcast %c0_i32_62 : i32 to vector<4x256xi32>
    %153 = arith.cmpi ne, %151, %152 : vector<4x256xi32>
    %c0_i32_63 = arith.constant 0 : i32
    %154 = vector.broadcast %c0_i32_63 : i32 to vector<4x256xi32>
    %155 = arith.cmpi slt, %151, %154 : vector<4x256xi32>
    %c0_i32_64 = arith.constant 0 : i32
    %156 = arith.cmpi slt, %149, %c0_i32_64 : i32
    %157 = vector.broadcast %156 : i1 to vector<4x256xi1>
    %158 = vector.broadcast %157 : vector<4x256xi1> to vector<4x256xi1>
    %159 = arith.xori %155, %158 : vector<4x256xi1>
    %160 = arith.andi %159, %153 : vector<4x256xi1>
    %161 = vector.broadcast %149 : i32 to vector<4x256xi32>
    %162 = arith.addi %151, %161 : vector<4x256xi32>
    %163 = arith.select %160, %162, %151 : vector<4x256xi1>, vector<4x256xi32>
    %c0_65 = arith.constant 0 : index
    %c0_66 = arith.constant 0 : index
    %164 = vector.load %arg5[%c0_65, %c0_66] : memref<4x1xf32, #tpu.memory_space<vmem>>, vector<4x1xf32>
    %165 = vector.shape_cast %164 : vector<4x1xf32> to vector<4x1xf32>
    %166 = vector.broadcast %165 : vector<4x1xf32> to vector<4x256xf32>
    %167 = vector.extract_strided_slice %146 {offsets = [0, 111], sizes = [4, 256], strides = [1, 1]} : vector<4x512xf32> to vector<4x256xf32>
    %c1_i32_67 = arith.constant 1 : i32
    %168 = vector.broadcast %c1_i32_67 : i32 to vector<4x256xi32>
    %169 = arith.cmpi sge, %163, %168 : vector<4x256xi32>
    %cst_68 = arith.constant 0.000000e+00 : f32
    %170 = vector.broadcast %cst_68 : f32 to vector<4x256xf32>
    %171 = arith.select %169, %167, %170 : vector<4x256xi1>, vector<4x256xf32>
    %c0_69 = arith.constant 0 : index
    %c0_70 = arith.constant 0 : index
    %c0_71 = arith.constant 0 : index
    %172 = vector.load %arg4[%c0_69, %c0_70, %c0_71] : memref<9x4x4xf32, #tpu.memory_space<vmem>>, vector<1x4x4xf32>
    %173 = vector.shape_cast %172 : vector<1x4x4xf32> to vector<4x4xf32>
    %174 = arith.truncf %173 : vector<4x4xf32> to vector<4x4xbf16>
    %175 = arith.truncf %171 : vector<4x256xf32> to vector<4x256xbf16>
    %cst_72 = arith.constant dense<0.000000e+00> : vector<4x256xf32>
    %176 = tpu.matmul %174, %175, %cst_72 {dimension_numbers = #tpu.dot_dimension_numbers<[1], [0], [0], [1], [0, 0, 1, 1], [], []>} : vector<4x4xbf16>, vector<4x256xbf16>, vector<4x256xf32> -> vector<4x256xf32>
    %177 = arith.addf %166, %176 : vector<4x256xf32>
    %178 = vector.extract_strided_slice %146 {offsets = [0, 112], sizes = [4, 256], strides = [1, 1]} : vector<4x512xf32> to vector<4x256xf32>
    %c1_73 = arith.constant 1 : index
    %c0_74 = arith.constant 0 : index
    %c0_75 = arith.constant 0 : index
    %179 = vector.load %arg4[%c1_73, %c0_74, %c0_75] : memref<9x4x4xf32, #tpu.memory_space<vmem>>, vector<1x4x4xf32>
    %180 = vector.shape_cast %179 : vector<1x4x4xf32> to vector<4x4xf32>
    %181 = arith.truncf %180 : vector<4x4xf32> to vector<4x4xbf16>
    %182 = arith.truncf %178 : vector<4x256xf32> to vector<4x256xbf16>
    %cst_76 = arith.constant dense<0.000000e+00> : vector<4x256xf32>
    %183 = tpu.matmul %181, %182, %cst_76 {dimension_numbers = #tpu.dot_dimension_numbers<[1], [0], [0], [1], [0, 0, 1, 1], [], []>} : vector<4x4xbf16>, vector<4x256xbf16>, vector<4x256xf32> -> vector<4x256xf32>
    %184 = arith.addf %177, %183 : vector<4x256xf32>
    %185 = vector.extract_strided_slice %146 {offsets = [0, 113], sizes = [4, 256], strides = [1, 1]} : vector<4x512xf32> to vector<4x256xf32>
    %c15_i32_77 = arith.constant 15 : i32
    %186 = vector.broadcast %c15_i32_77 : i32 to vector<4x256xi32>
    %187 = arith.cmpi slt, %163, %186 : vector<4x256xi32>
    %cst_78 = arith.constant 0.000000e+00 : f32
    %188 = vector.broadcast %cst_78 : f32 to vector<4x256xf32>
    %189 = arith.select %187, %185, %188 : vector<4x256xi1>, vector<4x256xf32>
    %c2_79 = arith.constant 2 : index
    %c0_80 = arith.constant 0 : index
    %c0_81 = arith.constant 0 : index
    %190 = vector.load %arg4[%c2_79, %c0_80, %c0_81] : memref<9x4x4xf32, #tpu.memory_space<vmem>>, vector<1x4x4xf32>
    %191 = vector.shape_cast %190 : vector<1x4x4xf32> to vector<4x4xf32>
    %192 = arith.truncf %191 : vector<4x4xf32> to vector<4x4xbf16>
    %193 = arith.truncf %189 : vector<4x256xf32> to vector<4x256xbf16>
    %cst_82 = arith.constant dense<0.000000e+00> : vector<4x256xf32>
    %194 = tpu.matmul %192, %193, %cst_82 {dimension_numbers = #tpu.dot_dimension_numbers<[1], [0], [0], [1], [0, 0, 1, 1], [], []>} : vector<4x4xbf16>, vector<4x256xbf16>, vector<4x256xf32> -> vector<4x256xf32>
    %195 = arith.addf %184, %194 : vector<4x256xf32>
    %196 = vector.extract_strided_slice %146 {offsets = [0, 127], sizes = [4, 256], strides = [1, 1]} : vector<4x512xf32> to vector<4x256xf32>
    %c1_i32_83 = arith.constant 1 : i32
    %197 = vector.broadcast %c1_i32_83 : i32 to vector<4x256xi32>
    %198 = arith.cmpi sge, %163, %197 : vector<4x256xi32>
    %cst_84 = arith.constant 0.000000e+00 : f32
    %199 = vector.broadcast %cst_84 : f32 to vector<4x256xf32>
    %200 = arith.select %198, %196, %199 : vector<4x256xi1>, vector<4x256xf32>
    %c3_85 = arith.constant 3 : index
    %c0_86 = arith.constant 0 : index
    %c0_87 = arith.constant 0 : index
    %201 = vector.load %arg4[%c3_85, %c0_86, %c0_87] : memref<9x4x4xf32, #tpu.memory_space<vmem>>, vector<1x4x4xf32>
    %202 = vector.shape_cast %201 : vector<1x4x4xf32> to vector<4x4xf32>
    %203 = arith.truncf %202 : vector<4x4xf32> to vector<4x4xbf16>
    %204 = arith.truncf %200 : vector<4x256xf32> to vector<4x256xbf16>
    %cst_88 = arith.constant dense<0.000000e+00> : vector<4x256xf32>
    %205 = tpu.matmul %203, %204, %cst_88 {dimension_numbers = #tpu.dot_dimension_numbers<[1], [0], [0], [1], [0, 0, 1, 1], [], []>} : vector<4x4xbf16>, vector<4x256xbf16>, vector<4x256xf32> -> vector<4x256xf32>
    %206 = arith.addf %195, %205 : vector<4x256xf32>
    %207 = vector.extract_strided_slice %146 {offsets = [0, 128], sizes = [4, 256], strides = [1, 1]} : vector<4x512xf32> to vector<4x256xf32>
    %c4_89 = arith.constant 4 : index
    %c0_90 = arith.constant 0 : index
    %c0_91 = arith.constant 0 : index
    %208 = vector.load %arg4[%c4_89, %c0_90, %c0_91] : memref<9x4x4xf32, #tpu.memory_space<vmem>>, vector<1x4x4xf32>
    %209 = vector.shape_cast %208 : vector<1x4x4xf32> to vector<4x4xf32>
    %210 = arith.truncf %209 : vector<4x4xf32> to vector<4x4xbf16>
    %211 = arith.truncf %207 : vector<4x256xf32> to vector<4x256xbf16>
    %cst_92 = arith.constant dense<0.000000e+00> : vector<4x256xf32>
    %212 = tpu.matmul %210, %211, %cst_92 {dimension_numbers = #tpu.dot_dimension_numbers<[1], [0], [0], [1], [0, 0, 1, 1], [], []>} : vector<4x4xbf16>, vector<4x256xbf16>, vector<4x256xf32> -> vector<4x256xf32>
    %213 = arith.addf %206, %212 : vector<4x256xf32>
    %214 = vector.extract_strided_slice %146 {offsets = [0, 129], sizes = [4, 256], strides = [1, 1]} : vector<4x512xf32> to vector<4x256xf32>
    %c15_i32_93 = arith.constant 15 : i32
    %215 = vector.broadcast %c15_i32_93 : i32 to vector<4x256xi32>
    %216 = arith.cmpi slt, %163, %215 : vector<4x256xi32>
    %cst_94 = arith.constant 0.000000e+00 : f32
    %217 = vector.broadcast %cst_94 : f32 to vector<4x256xf32>
    %218 = arith.select %216, %214, %217 : vector<4x256xi1>, vector<4x256xf32>
    %c5_95 = arith.constant 5 : index
    %c0_96 = arith.constant 0 : index
    %c0_97 = arith.constant 0 : index
    %219 = vector.load %arg4[%c5_95, %c0_96, %c0_97] : memref<9x4x4xf32, #tpu.memory_space<vmem>>, vector<1x4x4xf32>
    %220 = vector.shape_cast %219 : vector<1x4x4xf32> to vector<4x4xf32>
    %221 = arith.truncf %220 : vector<4x4xf32> to vector<4x4xbf16>
    %222 = arith.truncf %218 : vector<4x256xf32> to vector<4x256xbf16>
    %cst_98 = arith.constant dense<0.000000e+00> : vector<4x256xf32>
    %223 = tpu.matmul %221, %222, %cst_98 {dimension_numbers = #tpu.dot_dimension_numbers<[1], [0], [0], [1], [0, 0, 1, 1], [], []>} : vector<4x4xbf16>, vector<4x256xbf16>, vector<4x256xf32> -> vector<4x256xf32>
    %224 = arith.addf %213, %223 : vector<4x256xf32>
    %225 = vector.extract_strided_slice %146 {offsets = [0, 143], sizes = [4, 256], strides = [1, 1]} : vector<4x512xf32> to vector<4x256xf32>
    %c1_i32_99 = arith.constant 1 : i32
    %226 = vector.broadcast %c1_i32_99 : i32 to vector<4x256xi32>
    %227 = arith.cmpi sge, %163, %226 : vector<4x256xi32>
    %cst_100 = arith.constant 0.000000e+00 : f32
    %228 = vector.broadcast %cst_100 : f32 to vector<4x256xf32>
    %229 = arith.select %227, %225, %228 : vector<4x256xi1>, vector<4x256xf32>
    %c6_101 = arith.constant 6 : index
    %c0_102 = arith.constant 0 : index
    %c0_103 = arith.constant 0 : index
    %230 = vector.load %arg4[%c6_101, %c0_102, %c0_103] : memref<9x4x4xf32, #tpu.memory_space<vmem>>, vector<1x4x4xf32>
    %231 = vector.shape_cast %230 : vector<1x4x4xf32> to vector<4x4xf32>
    %232 = arith.truncf %231 : vector<4x4xf32> to vector<4x4xbf16>
    %233 = arith.truncf %229 : vector<4x256xf32> to vector<4x256xbf16>
    %cst_104 = arith.constant dense<0.000000e+00> : vector<4x256xf32>
    %234 = tpu.matmul %232, %233, %cst_104 {dimension_numbers = #tpu.dot_dimension_numbers<[1], [0], [0], [1], [0, 0, 1, 1], [], []>} : vector<4x4xbf16>, vector<4x256xbf16>, vector<4x256xf32> -> vector<4x256xf32>
    %235 = arith.addf %224, %234 : vector<4x256xf32>
    %236 = vector.extract_strided_slice %146 {offsets = [0, 144], sizes = [4, 256], strides = [1, 1]} : vector<4x512xf32> to vector<4x256xf32>
    %c7_105 = arith.constant 7 : index
    %c0_106 = arith.constant 0 : index
    %c0_107 = arith.constant 0 : index
    %237 = vector.load %arg4[%c7_105, %c0_106, %c0_107] : memref<9x4x4xf32, #tpu.memory_space<vmem>>, vector<1x4x4xf32>
    %238 = vector.shape_cast %237 : vector<1x4x4xf32> to vector<4x4xf32>
    %239 = arith.truncf %238 : vector<4x4xf32> to vector<4x4xbf16>
    %240 = arith.truncf %236 : vector<4x256xf32> to vector<4x256xbf16>
    %cst_108 = arith.constant dense<0.000000e+00> : vector<4x256xf32>
    %241 = tpu.matmul %239, %240, %cst_108 {dimension_numbers = #tpu.dot_dimension_numbers<[1], [0], [0], [1], [0, 0, 1, 1], [], []>} : vector<4x4xbf16>, vector<4x256xbf16>, vector<4x256xf32> -> vector<4x256xf32>
    %242 = arith.addf %235, %241 : vector<4x256xf32>
    %243 = vector.extract_strided_slice %146 {offsets = [0, 145], sizes = [4, 256], strides = [1, 1]} : vector<4x512xf32> to vector<4x256xf32>
    %c15_i32_109 = arith.constant 15 : i32
    %244 = vector.broadcast %c15_i32_109 : i32 to vector<4x256xi32>
    %245 = arith.cmpi slt, %163, %244 : vector<4x256xi32>
    %cst_110 = arith.constant 0.000000e+00 : f32
    %246 = vector.broadcast %cst_110 : f32 to vector<4x256xf32>
    %247 = arith.select %245, %243, %246 : vector<4x256xi1>, vector<4x256xf32>
    %c8_111 = arith.constant 8 : index
    %c0_112 = arith.constant 0 : index
    %c0_113 = arith.constant 0 : index
    %248 = vector.load %arg4[%c8_111, %c0_112, %c0_113] : memref<9x4x4xf32, #tpu.memory_space<vmem>>, vector<1x4x4xf32>
    %249 = vector.shape_cast %248 : vector<1x4x4xf32> to vector<4x4xf32>
    %250 = arith.truncf %249 : vector<4x4xf32> to vector<4x4xbf16>
    %251 = arith.truncf %247 : vector<4x256xf32> to vector<4x256xbf16>
    %cst_114 = arith.constant dense<0.000000e+00> : vector<4x256xf32>
    %252 = tpu.matmul %250, %251, %cst_114 {dimension_numbers = #tpu.dot_dimension_numbers<[1], [0], [0], [1], [0, 0, 1, 1], [], []>} : vector<4x4xbf16>, vector<4x256xbf16>, vector<4x256xf32> -> vector<4x256xf32>
    %253 = arith.addf %242, %252 : vector<4x256xf32>
    %cst_115 = arith.constant 2.000000e-01 : f32
    %254 = vector.broadcast %cst_115 : f32 to vector<4x256xf32>
    %255 = arith.mulf %254, %253 : vector<4x256xf32>
    %256 = arith.maximumf %253, %255 : vector<4x256xf32>
    %257 = arith.addf %1, %256 : vector<4x256xf32>
    %c0_116 = arith.constant 0 : index
    %c0_117 = arith.constant 0 : index
    %c0_118 = arith.constant 0 : index
    %258 = vector.load %arg8[%c0_116, %c0_117, %c0_118] : memref<1x4x256xf32, #tpu.memory_space<vmem>>, vector<1x4x256xf32>
    %259 = vector.shape_cast %258 : vector<1x4x256xf32> to vector<4x256xf32>
    %260 = vector.shape_cast %257 : vector<4x256xf32> to vector<1x4x256xf32>
    tpu.vector_store %arg8[%c0_116, %c0_117, %c0_118], %260 {strides = array<i32>} : memref<1x4x256xf32, #tpu.memory_space<vmem>>, vector<1x4x256xf32>,
    return
  }
  func.func @transform_0(%arg0: i32) -> (i32, i32, i32) {
    %c0_i32 = arith.constant 0 : i32
    %c0_i32_0 = arith.constant 0 : i32
    %c0_i32_1 = arith.constant 0 : i32
    return %arg0, %c0_i32, %c0_i32_0 : i32, i32, i32
  }
  func.func @transform_1(%arg0: i32) -> (i32, i32, i32) {
    %c0_i32 = arith.constant 0 : i32
    %c0_i32_0 = arith.constant 0 : i32
    %c0_i32_1 = arith.constant 0 : i32
    %c0_i32_2 = arith.constant 0 : i32
    return %c0_i32, %c0_i32_0, %c0_i32_1 : i32, i32, i32
  }
  func.func @transform_2(%arg0: i32) -> (i32, i32) {
    %c0_i32 = arith.constant 0 : i32
    %c0_i32_0 = arith.constant 0 : i32
    %c0_i32_1 = arith.constant 0 : i32
    return %c0_i32, %c0_i32_0 : i32, i32
  }
  func.func @transform_3(%arg0: i32) -> (i32, i32, i32) {
    %c0_i32 = arith.constant 0 : i32
    %c0_i32_0 = arith.constant 0 : i32
    %c0_i32_1 = arith.constant 0 : i32
    %c0_i32_2 = arith.constant 0 : i32
    return %c0_i32, %c0_i32_0, %c0_i32_1 : i32, i32, i32
  }
  func.func @transform_4(%arg0: i32) -> (i32, i32) {
    %c0_i32 = arith.constant 0 : i32
    %c0_i32_0 = arith.constant 0 : i32
    %c0_i32_1 = arith.constant 0 : i32
    return %c0_i32, %c0_i32_0 : i32, i32
  }
  func.func @transform_5(%arg0: i32) -> (i32, i32) {
    %c0_i32 = arith.constant 0 : i32
    %c0_i32_0 = arith.constant 0 : i32
    %c0_i32_1 = arith.constant 0 : i32
    return %c0_i32, %c0_i32_0 : i32, i32
  }
  func.func @transform_6(%arg0: i32) -> (i32, i32) {
    %c0_i32 = arith.constant 0 : i32
    %c0_i32_0 = arith.constant 0 : i32
    %c0_i32_1 = arith.constant 0 : i32
    return %c0_i32, %c0_i32_0 : i32, i32
  }
  func.func @transform_7(%arg0: i32) -> (i32, i32, i32) {
    %c0_i32 = arith.constant 0 : i32
    %c0_i32_0 = arith.constant 0 : i32
    %c0_i32_1 = arith.constant 0 : i32
    return %arg0, %c0_i32, %c0_i32_0 : i32, i32, i32
  }
}

</mosaic_0001>

<bundles_post_ra>
// kernel: tpu_custom_call.1
= control target key start
LH: loop header
LB: loop body
LE: loop exit
PB: predicated region body
PF: predicated region fallthrough
CT: control target
= control target key end

     0   :  { %12 = vsyncpa [#allocation3], 0  ;;  %s2457_s0 = inlined_call_operand.vmem [shape: f32[2,4,256], index: 0, kind: input, shape index: {}]   ;;  %s2458_s1 = inlined_call_operand.vmem [shape: f32[9,4,4], index: 1, kind: input, shape index: {}]   ;;  %s2459_s2 = inlined_call_operand.vmem [shape: f32[4,1], index: 2, kind: input, shape index: {}]   ;;  %s2460_s3 = inlined_call_operand.vmem [shape: f32[9,4,4], index: 3, kind: input, shape index: {}]   ;;  %s2461_s4 = inlined_call_operand.vmem [shape: f32[4,1], index: 4, kind: input, shape index: {}]   ;;  %s2462_s5 = inlined_call_operand.vmem [shape: f32[4,1], index: 5, kind: input, shape index: {}]   ;;  %s2463_s6 = inlined_call_operand.vmem [shape: f32[4,1], index: 6, kind: input, shape index: {}]   ;;  %s2464_s7 = inlined_call_operand.hbm [shape: f32[2,4,256], index: 7, kind: output, shape index: {}]  }
   0x1   :  { %14 = vsyncpa [#allocation3 + $0x1], 0  ;;  %s2018_s24 = smov 0   ;;  %s2020_s25 = smov 0  }
   0x2   :  { %s2022_s26 = smov 0   ;;  %s2024_s27 = smov 0  }
   0x3 LB: > { %s2039_s28 = sadd.s32 4294967295, %s1964_s27   ;;  %s1653_s29 = sadd.s32 4294967294, %s1964_s27   ;;  %s1964_s27 = sphi %s2024_s27, %s2478_s27   ;;  %s1960_s26 = sphi %s2022_s26, %s2477_s26   ;;  %s1956_s25 = sphi %s2020_s25, %s2476_s25   ;;  %s1952_s24 = sphi %s2018_s24, %s2475_s24  }
   0x4   : > { %s2043_s30 = sadd.s32 1, %s1964_s27   ;;  %s179_s8 = sadd.s32 1, %s1960_s26 }
   0x5   : > { %s176_s9 = ssub.s32 %s1964_s27, %s2043_s30  ;;  %p189_p0 = scmp.ne.s32.totalorder %s1960_s26, %s1956_s25 }
   0x6   : > { %p177_p1 = scmp.eq.s32.totalorder %s176_s9, 0  ;;  %p190_p2 = scmp.eq.s32.totalorder %s2039_s28, 1 }
   0x7   : > { %p195_p3 = scmp.ne.s32.totalorder %s1956_s25, %s1952_s24  ;;  %p196_p4 = scmp.eq.s32.totalorder %s1653_s29, 1 }
   0x8   : > { %s2054_s10 = scalar_select %p177_p1, %s1960_s26, %s179_s8  }
   0x9   : > { %p2056_p5 = por %p190_p2, %p189_p0  ;;  %p2060_p6 = por %p196_p4, %p195_p3 }
   0xa   : > { %p1656_p7 = scmp.ge.s32.totalorder %s1964_s27, 1  ;;  %p240_p8 = scmp.lt.s32.totalorder %s1964_s27, 3 }
   0xc   : > { %p241_p9 = pnand %p1656_p7, %p240_p8 }
   0xd   : > { %p272_p10 = scmp.lt.s32.totalorder (!%p241_p9), %s2039_s28, 1  ;;  %v1966_v0 = vmov (!%p241_p9), 0.0|0.0   ;;  %s1967_s14 = smov (!%p241_p9), 16   ;;  %v1968_v2 = vmov (!%p241_p9), 0   ;;  %v1969_v3 = vmov (!%p241_p9), 0.0   ;;  %v282_v10 = vlaneseq (!%p241_p9) }
   0xe   : > { %244 = sbr.rel (%p241_p9) target bundleno = 1376 (0x560), region = 48  ;;  %398 = vrot.lane.b32.xlu1 (!%p241_p9), %v1966_v0, %s1967_s14  ;;  %378 = vmatprep.mubr.bf16.mxu0 (!%p241_p9), %v1968_v2  ;;  %s1970_s19 = smov (!%p241_p9), 17   ;;  %v309_v9 = vld [vmem:[%s2459_s2] sm:$0xf] (!%p241_p9)  ;;  %vm324_vm0 = vcmask (!%p241_p9), 138240   ;;  %vm404_vm3 = vcmask (!%p241_p9), 130048  }
   0xf   : > { %1867 = vset.pattern.permute.xlu0 (!%p241_p9), %v1968_v2  ;;  %1868 = vset.pattern.permute.xlu1 (!%p241_p9), %v1968_v2  ;;  %s1971_s20 = smov (!%p241_p9), 15   ;;  %s1972_s21 = smov (!%p241_p9), 1   ;;  %v283_v11 = vand.u32 (!%p241_p9), 127, %v282_v10  ;;  %v331_v27 = vld [vmem:[%s2458_s1] sm:$0xf] (!%p241_p9)  ;;  %vm339_vm4 = vcmask (!%p241_p9), 1041408  }
  0x10   : > { %1042 = vmatprep.mubr.bf16.mxu1 (!%p241_p9), %v1968_v2  ;;  %s1973_s22 = smov (!%p241_p9), 127   ;;  %s1974_s23 = smov (!%p241_p9), 113   ;;  %v332_v33 = vpack.c.bf16 (!%p241_p9), %v331_v27, %v331_v27  ;;  %vm335_vm5 = vcmask (!%p241_p9), 31744   ;;  %vm467_vm6 = vcmask (!%p241_p9), 121856   ;;  %vm537_vm9 = vcmask (!%p241_p9), 7168  }
  0x11   : > { %s1975_s29 = smov (!%p241_p9), 112   ;;  %s1976_s8 = smov (!%p241_p9), 111   ;;  %v284_v12 = vadd.s32 (!%p241_p9), 128, %v283_v11  ;;  %v289_v14 = vand.u32 (!%p241_p9), 15, %v283_v11  ;;  %v1662_v51 = vld [vmem:[%s2458_s1 + $0x4] sm:$0xf] (!%p241_p9) }
  0x12   : > { %v391_v54 = vpack.c.bf16 (!%p241_p9), %v1662_v51, %v1662_v51  ;;  %v1665_v60 = vld [vmem:[%s2458_s1 + $0x8] sm:$0xf] (!%p241_p9)  ;;  %vm662_vm10 = vcmask (!%p241_p9), 1039360   ;;  %vm732_vm11 = vcmask (!%p241_p9), 924672   ;;  %vm805_vm12 = vcmask (!%p241_p9), 916480  }
  0x13   : > { %v296_v15 = vand.u32 (!%p241_p9), 15, %v284_v12  ;;  %vm2119_vm1 = vcmp.ge.s32.totalorder (!%p241_p9), %v289_v14, 1  ;;  %vm2157_vm8 = vcmp.lt.s32.totalorder (!%p241_p9), %v289_v14, 15  ;;  %v476_v62 = vpack.c.bf16 (!%p241_p9), %v1665_v60, %v1665_v60  ;;  %v1680_v60 = vld [vmem:[%s2458_s1 + $0x1c] sm:$0xf] (!%p241_p9) }
  0x14   : > { %vm866_vm13 = vcmask (!%p241_p9), 908288   ;;  %vm934_vm14 = vcmask (!%p241_p9), 1043456   ;;  %v1703_v19 = vld [vmem:[%s2460_s3 + $0x18] sm:$0xf] (!%p241_p9) }
  0x15   : > { %s273_s13 = scalar_select %p272_p10, %s2039_s28, 1  ;;  %vm2123_vm2 = vcmp.ge.s32.totalorder %v296_v15, 1  ;;  %vm2151_vm7 = vcmp.lt.s32.totalorder %v296_v15, 15 }
  0x17   : > { %s1717_s15 = sshll.u32 %s273_s13, 3 }
  0x18   : > { %s276_s18 = scalar_lea.vmem %s2457_s0, %s1717_s15 }
  0x19   : > { %v2072_v1 = vld [vmem:[%s276_s18] sm:$0xff] }
  0x1a   : > { %v1837_v4 = vpack.i.bf16 %v2072_v1, %v1969_v3  ;;  %v2079_v5 = vpack.c.bf16 %v2072_v1, %v2072_v1  ;;  %v280_v6 = vcombine.high %v2072_v1, %v2072_v1 }
  0x1c   : > { %1838 = vrot.lane.b32.xlu0 %v1837_v4, %s1970_s19  ;;  %400 = vrot.lane.b32.xlu1 %v2079_v5, %s1967_s14  ;;  %v2089_v7 = vpack.c.bf16 %v280_v6, %v280_v6  ;;  %v1852_v8 = vpack.i.bf16 %v280_v6, %v2072_v1  ;;  %v608_v15 = vsel %vm339_vm4, %v2079_v5, 0 }
  0x20   : > { %322 = vrot.lane.b32.xlu0 %v280_v6, %s1970_s19  ;;  %1843 = vrot.lane.b32.xlu1 %v1837_v4, %s1971_s20 }
  0x24   : > { %402 = vrot.lane.b32.xlu0 %v2089_v7, %s1967_s14  ;;  %1848 = vrot.lane.b32.xlu1 %v1837_v4, %s1972_s21 }
  0x28   : > { %465 = vrot.lane.b32.xlu0 %v280_v6, %s1971_s20  ;;  %1853 = vrot.lane.b32.xlu1 %v1852_v8, %s1973_s22 }
  0x2c   : > { %535 = vrot.lane.b32.xlu0 %v280_v6, %s1972_s21  ;;  %1858 = vrot.lane.b32.xlu1 %v1852_v8, %s1974_s23 }
  0x30   : > { %660 = vrot.lane.b32.xlu0 %v1969_v3, %s1973_s22  ;;  %799 = vrot.lane.b32.xlu1 %v2079_v5, %s1975_s29 }
  0x34   : > { %730 = vrot.lane.b32.xlu0 %v1969_v3, %s1974_s23  ;;  %803 = vrot.lane.b32.xlu1 %v1966_v0, %s1975_s29 }
  0x38   : > { %801 = vrot.lane.b32.xlu0 %v2089_v7, %s1975_s29  ;;  %864 = vrot.lane.b32.xlu1 %v1969_v3, %s1976_s8 }
  0x3c   : > { %1863 = vrot.lane.b32.xlu0 %v1852_v8, %s1976_s8  ;;  %v1668_v8 = vld [vmem:[%s2458_s1 + $0xc] sm:$0xf] }
  0x3d   : > { %v546_v11 = vpack.c.bf16 %v1668_v8, %v1668_v8 }
  0x40   : > { %312 = vperm.xlu0 %1867, %v309_v9  }
  0x80   : > { %v2113_v13 = vpop.permute.xlu1 %398 }
  0x8e   : > { %v2115_v16 = vpop.permute.xlu0 %1838  ;;  %v401_v20 = vpop.permute.xlu1 %400 }
  0x8f   : > { %v1841_v17 = vunpack.i.h.bf16 %v2115_v16  ;;  %v1840_v18 = vunpack.i.l.bf16 %v2115_v16  ;;  %v405_v31 = vsel %vm404_vm3, %v2113_v13, %v401_v20 }
  0x90   : > { %v411_v39 = vsel %vm339_vm4, %v405_v31, 0 }
  0x91   : > { %v325_v22 = vsel %vm324_vm0, %v1840_v18, %v1841_v17 }
  0x92   : > { %v323_v23 = vpop.permute.xlu0 %322  ;;  %v329_v24 = vsel %vm2119_vm1, %v325_v22, 0.0  ;;  %v2138_v29 = vpop.permute.xlu1 %1843 }
  0x93   : > { %v326_v25 = vsel %vm324_vm0, %v1841_v17, %v323_v23  ;;  %v333_v26 = vpack.c.bf16 %v329_v24, %v329_v24  ;;  %v1846_v36 = vunpack.i.h.bf16 %v2138_v29  ;;  %v1845_v37 = vunpack.i.l.bf16 %v2138_v29  ;;  %v1671_v24 = vld [vmem:[%s2458_s1 + $0x10] sm:$0xf] }
  0x94   : > { %v330_v28 = vsel %vm2123_vm2, %v326_v25, 0.0  ;;  %v603_v27 = vpack.c.bf16 %v1671_v24, %v1671_v24 }
  0x95   : > { %v334_v30 = vpack.c.bf16 %v330_v28, %v330_v28  ;;  %v341_v34 = vsel %vm339_vm4, %v333_v26, 0  ;;  %v468_v44 = vsel %vm467_vm6, %v1845_v37, %v1846_v36 }
  0x96   : > { %v403_v32 = vpop.permute.xlu0 %402  ;;  %v2147_v38 = vpop.permute.xlu1 %1848  ;;  %v472_v48 = vsel %vm2157_vm8, %v468_v44, 0.0 }
  0x97   : > { %1660 = vmatprep.subr.msk.bf16.mxu0 %vm339_vm4, %v334_v30  ;;  %v406_v35 = vsel %vm404_vm3, %v401_v20, %v403_v32  ;;  %v1851_v45 = vunpack.i.h.bf16 %v2147_v38  ;;  %v477_v52 = vpack.c.bf16 %v472_v48, %v472_v48  ;;  %v1850_v55 = vunpack.i.l.bf16 %v2147_v38 }
  0x98   : > { %347 = vmatpush1.bf16.msra.mxu0 %v341_v34 }
  0x99   : > { %1663 = vmatprep.subr.msk.bf16.mxu0 %vm339_vm4, %v406_v35  ;;  %v483_v56 = vsel %vm339_vm4, %v477_v52, 0  ;;  %v538_v58 = vsel %vm537_vm9, %v1850_v55, %v1851_v45  ;;  %v1674_v35 = vld [vmem:[%s2458_s1 + $0x14] sm:$0xf] }
  0x9a   : > { %v466_v41 = vpop.permute.xlu0 %465  ;;  %v542_v59 = vsel %vm2119_vm1, %v538_v58, 0.0  ;;  %v1854_v63 = vpop.permute.xlu1 %1853 }
  0x9b   : > { %1661 = vmatmul.mubr.msk.bf16.vlgmr.msra.gmra.mrb[0].mxu0 %vm335_vm5, %v332_v33  ;;  %v469_v42 = vsel %vm467_vm6, %v1846_v36, %v466_v41  ;;  %v547_v61 = vpack.c.bf16 %v542_v59, %v542_v59  ;;  %v1856_v3 = vunpack.i.h.bf16 %v1854_v63  ;;  %v1855_v12 = vunpack.i.l.bf16 %v1854_v63 }
  0x9c   : > { %417 = vmatpush1.bf16.msra.mxu0 %v411_v39  ;;  %v473_v46 = vsel %vm2151_vm7, %v469_v42, 0.0  ;;  %448 = vmatprep.mubr.bf16.mxu0 %v1968_v2  ;;  %v671_v41 = vpack.c.bf16 %v1674_v35, %v1674_v35 }
  0x9d   : > { %v478_v47 = vpack.c.bf16 %v473_v46, %v473_v46  ;;  %v553_v0 = vsel %vm339_vm4, %v547_v61, 0 }
  0x9e   : > { %v536_v49 = vpop.permute.xlu0 %535  ;;  %v1859_v14 = vpop.permute.xlu1 %1858 }
  0x9f   : > { %1666 = vmatprep.subr.msk.bf16.mxu0 %vm339_vm4, %v478_v47  ;;  %v539_v50 = vsel %vm537_vm9, %v1851_v45, %v536_v49  ;;  %v1861_v20 = vunpack.i.h.bf16 %v1859_v14  ;;  %v1860_v28 = vunpack.i.l.bf16 %v1859_v14 }
  0xa0   : > { %v543_v53 = vsel %vm2123_vm2, %v539_v50, 0.0  ;;  %v1677_v50 = vld [vmem:[%s2458_s1 + $0x18] sm:$0xf] }
  0xa1   : > { %v548_v57 = vpack.c.bf16 %v543_v53, %v543_v53  ;;  %v733_v32 = vsel %vm732_vm11, %v1860_v28, %v1861_v20  ;;  %v741_v53 = vpack.c.bf16 %v1677_v50, %v1677_v50 }
  0xa2   : > { %v2193_v4 = vpop.permute.xlu0 %660  ;;  %v800_v33 = vpop.permute.xlu1 %799  ;;  %v737_v34 = vsel %vm2119_vm1, %v733_v32, 0.0 }
  0xa3   : > { %v664_v6 = vsel %vm662_vm10, %v1856_v3, %v2193_v4  ;;  %v742_v39 = vpack.c.bf16 %v737_v34, %v737_v34 }
  0xa4   : > { %v668_v9 = vsel %vm2151_vm7, %v664_v6, 0.0 }
  0xa5   : > { %v673_v17 = vpack.c.bf16 %v668_v9, %v668_v9  ;;  %v748_v45 = vsel %vm339_vm4, %v742_v39, 0 }
  0xa6   : > { %v2209_v22 = vpop.permute.xlu0 %730  ;;  %v2231_v42 = vpop.permute.xlu1 %803 }
  0xa7   : > { %1664 = vmatmul.mubr.msk.bf16.vlgmr.msra.gmra.mrb[0].mxu0 %vm335_vm5, %v391_v54  ;;  %v734_v5 = vsel %vm732_vm11, %v1861_v20, %v2209_v22 }
  0xa8   : > { %489 = vmatpush1.bf16.msra.mxu0 %v483_v56  ;;  %520 = vmatprep.mubr.bf16.mxu0 %v1968_v2  ;;  %v738_v26 = vsel %vm2123_vm2, %v734_v5, 0.0 }
  0xa9   : > { %1669 = vmatprep.subr.msk.bf16.mxu0 %vm339_vm4, %v548_v57  ;;  %v743_v31 = vpack.c.bf16 %v738_v26, %v738_v26 }
  0xaa   : > { %v802_v36 = vpop.permute.xlu0 %801  ;;  %v2238_v48 = vpop.permute.xlu1 %864 }
  0xab   : > { %v807_v46 = vsel %vm805_vm12, %v802_v36, %v2231_v42  ;;  %v806_v51 = vsel %vm805_vm12, %v800_v33, %v802_v36 }
  0xac   : > { %v812_v56 = vsel %vm339_vm4, %v806_v51, 0 }
  0xae   : > { %v1864_v44 = vpop.permute.xlu0 %1863 }
  0xaf   : > { %v1866_v47 = vunpack.i.h.bf16 %v1864_v44  ;;  %v1865_v54 = vunpack.i.l.bf16 %v1864_v44  ;;  %v955_v44 = vshrl.u32 %v282_v10, 7 }
  0xb1   : > { %v868_v49 = vsel %vm866_vm13, %v1866_v47, %v2238_v48  ;;  %v867_v58 = vsel %vm866_vm13, %v1865_v54, %v1866_v47  ;;  %vm956_vm15 = vcmp.lt.s32.totalorder %v955_v44, 2 }
  0xb2   : > { %v872_v52 = vsel %vm2151_vm7, %v868_v49, 0.0  ;;  %v871_v59 = vsel %vm2157_vm8, %v867_v58, 0.0  ;;  %v958_v49 = vld [vmem:[%s2463_s6] sm:$0xf] }
  0xb3   : > { %1667 = vmatmul.mubr.msk.bf16.vlgmr.msra.gmra.mrb[0].mxu0 %vm335_vm5, %v476_v62  ;;  %v877_v57 = vpack.c.bf16 %v872_v52, %v872_v52  ;;  %v876_v61 = vpack.c.bf16 %v871_v59, %v871_v59  ;;  %v798_v62 = vpack.c.bf16 %v1680_v60, %v1680_v60 }
  0xb4   : > { %559 = vmatpush1.bf16.msra.mxu0 %v553_v0  ;;  %590 = vmatprep.mubr.bf16.mxu0 %v1968_v2  ;;  %v1683_v0 = vld [vmem:[%s2458_s1 + $0x20] sm:$0xf] }
  0xb5   : > { %1672 = vmatprep.subr.msk.bf16.mxu0 %vm339_vm4, %v2089_v7  ;;  %v663_v7 = vsel %vm662_vm10, %v1855_v12, %v1856_v3  ;;  %v882_v63 = vsel %vm339_vm4, %v876_v61, 0  ;;  %v875_v3 = vpack.c.bf16 %v1683_v0, %v1683_v0  ;;  %v979_v0 = vld [vmem:[%s2461_s4] sm:$0xf] }
  0xb6   : > { %v667_v23 = vsel %vm2157_vm8, %v663_v7, 0.0 }
  0xb7   : > { %v672_v25 = vpack.c.bf16 %v667_v23, %v667_v23 }
  0xb9   : > { %v678_v30 = vsel %vm339_vm4, %v672_v25, 0 }
  0xbf   : > { %1670 = vmatmul.mubr.msk.bf16.vlgmr.msra.gmra.mrb[0].mxu0 %vm335_vm5, %v546_v11  ;;  %v313_v6 = vpop.permute.xlu0 %312 }
  0xc0   : > { %614 = vmatpush1.bf16.msra.mxu0 %v608_v15  ;;  %645 = vmatprep.mubr.bf16.mxu0 %v1968_v2 }
  0xc1   : > { %1675 = vmatprep.subr.msk.bf16.mxu0 %vm339_vm4, %v673_v17 }
  0xcb   : > { %1673 = vmatmul.mubr.msk.bf16.vlgmr.msra.gmra.mrb[0].mxu0 %vm335_vm5, %v603_v27 }
  0xcc   : > { %684 = vmatpush1.bf16.msra.mxu0 %v678_v30  ;;  %715 = vmatprep.mubr.bf16.mxu0 %v1968_v2 }
  0xcd   : > { %1678 = vmatprep.subr.msk.bf16.mxu0 %vm339_vm4, %v743_v31 }
  0xd7   : > { %1676 = vmatmul.mubr.msk.bf16.vlgmr.msra.gmra.mrb[0].mxu0 %vm335_vm5, %v671_v41 }
  0xd8   : > { %754 = vmatpush1.bf16.msra.mxu0 %v748_v45  ;;  %785 = vmatprep.mubr.bf16.mxu0 %v1968_v2  ;;  %v957_v45 = vld [vmem:[%s2462_s5] sm:$0xf] }
  0xd9   : > { %1681 = vmatprep.subr.msk.bf16.mxu0 %vm339_vm4, %v807_v46 }
  0xe3   : > { %1679 = vmatmul.mubr.msk.bf16.vlgmr.msra.gmra.mrb[0].mxu0 %vm335_vm5, %v741_v53 }
  0xe4   : > { %818 = vmatpush1.bf16.msra.mxu0 %v812_v56  ;;  %849 = vmatprep.mubr.bf16.mxu0 %v1968_v2 }
  0xe5   : > { %1684 = vmatprep.subr.msk.bf16.mxu0 %vm339_vm4, %v877_v57 }
  0xef   : > { %1682 = vmatmul.mubr.msk.bf16.vlgmr.msra.gmra.mrb[0].mxu0 %vm335_vm5, %v798_v62 }
  0xf0   : > { %888 = vmatpush1.bf16.msra.mxu0 %v882_v63  ;;  %919 = vmatprep.mubr.bf16.mxu0 %v1968_v2 }
  0xfb   : > { %1685 = vmatmul.mubr.msk.bf16.vlgmr.msra.gmra.mrb[0].mxu0 %vm335_vm5, %v875_v3 }
 0x1ce   : > { %v921_v8 = vpop.f32.mrb[0].mxu0 }
 0x1cf   : > { %v1719_v9 = vadd.f32 %v921_v8, %v313_v6  ;;  %v923_v11 = vpop.f32.mrb[1].mxu0 }
 0x1d0   : > { %v1720_v12 = vadd.f32 %v923_v11, %v313_v6  ;;  %v925_v14 = vpop.f32.mrb[2].mxu0 }
 0x1d1   : > { %v930_v15 = vmul.f32 0.2, %v1719_v9  ;;  %v926_v17 = vpop.f32.mrb[3].mxu0 }
 0x1d2   : > { %v931_v7 = vmul.f32 0.2, %v1720_v12 }
 0x1d3   : > { %v932_v20 = vmax.f32 %v1719_v9, %v930_v15 }
 0x1d4   : > { %v933_v23 = vmax.f32 %v1720_v12, %v931_v7  ;;  %v997_v7 = vld [vmem:[%s2460_s3] sm:$0xf] }
 0x1d5   : > { %v935_v5 = vsel %vm934_vm14, %v932_v20, 0.0 }
 0x1d6   : > { %v936_v24 = vsel %vm934_vm14, %v933_v23, 0.0 }
 0x1d7   : > { %v937_v25 = vadd.f32 %v936_v24, %v935_v5 }
 0x1d9   : > { %938 = vadd.xlane.f32.xlu1 %v937_v25 }
 0x266   : > { %v939_v26 = vpop.xlane.xlu1 %938 }
 0x267   : > { %v941_v27 = vmul.f32 0.00390625, %v939_v26 }
 0x269   : > { %v942_v28 = vsub.f32 %v932_v20, %v941_v27  ;;  %v943_v30 = vsub.f32 %v933_v23, %v941_v27  ;;  %v961_v46 = vmul.f32 %v957_v45, %v941_v27 }
 0x26b   : > { %v944_v31 = vmul.f32 %v942_v28, %v942_v28  ;;  %v945_v32 = vmul.f32 %v943_v30, %v943_v30 }
 0x26d   : > { %v946_v33 = vsel %vm934_vm14, %v944_v31, 0.0  ;;  %v947_v34 = vsel %vm934_vm14, %v945_v32, 0.0 }
 0x26e   : > { %v948_v35 = vadd.f32 %v947_v34, %v946_v33 }
 0x270   : > { %949 = vadd.xlane.f32.xlu0 %v948_v35 }
 0x2fd   : > { %v950_v36 = vpop.xlane.xlu0 %949 }
 0x2fe   : > { %v951_v39 = vmul.f32 0.00390625, %v950_v36  ;;  %v1688_v36 = vld [vmem:[%s2460_s3 + $0x4] sm:$0xf] }
 0x2ff   : > { %v1055_v44 = vpack.c.bf16 %v1688_v36, %v1688_v36 }
 0x300   : > { %v952_v41 = vadd.f32 1e-05, %v951_v39 }
 0x302   : > { %1900 = vrsqrt.f32 %v952_v41 }
 0x30c   : > { %v1901_v47 = vpop.eup %1900 }
 0x30d   : > { %v959_v50 = vmul.f32 %v1901_v47, %v957_v45  ;;  %v962_v51 = vmul.f32 %v1901_v47, %v961_v46 }
 0x30f   : > { %v960_v52 = vsel %vm956_vm15, %v959_v50, 1.0  ;;  %v963_v53 = vsub.f32 %v958_v49, %v962_v51  ;;  %v1691_v49 = vld [vmem:[%s2460_s3 + $0x8] sm:$0xf] }
 0x310   : > { %967 = vperm.xlu1 %1868, %v960_v52   ;;  %v1130_v51 = vpack.c.bf16 %v1691_v49, %v1691_v49 }
 0x311   : > { %v964_v54 = vsel %vm956_vm15, %v963_v53, 0.0 }
 0x312   : > { %974 = vperm.xlu0 %1867, %v964_v54  }
 0x38f   : > { %v968_v56 = vpop.permute.xlu1 %967 }
 0x390   : > { %v970_v10 = vmul.f32 %v968_v56, %v932_v20  ;;  %v971_v57 = vmul.f32 %v968_v56, %v933_v23 }
 0x391   : > { %v975_v58 = vpop.permute.xlu0 %974 }
 0x392   : > { %v977_v59 = vadd.f32 %v975_v58, %v970_v10  ;;  %v978_v60 = vadd.f32 %v975_v58, %v971_v57 }
 0x394   : > { %v2273_v61 = vpack.c.bf16 %v978_v60, %v978_v60  ;;  %v1869_v62 = vpack.i.bf16 %v978_v60, %v977_v59  ;;  %v2278_v63 = vpack.c.bf16 %v977_v59, %v977_v59 }
 0x396   : > { %1062 = vrot.lane.b32.xlu0 %v2273_v61, %s1967_s14  ;;  %1870 = vrot.lane.b32.xlu1 %v1869_v62, %s1970_s19  ;;  %v1259_v60 = vsel %vm339_vm4, %v2278_v63, 0 }
 0x39a   : > { %1880 = vrot.lane.b32.xlu0 %v1869_v62, %s1972_s21  ;;  %1060 = vrot.lane.b32.xlu1 %v2278_v63, %s1967_s14 }
 0x39e   : > { %1890 = vrot.lane.b32.xlu0 %v1869_v62, %s1974_s23  ;;  %1875 = vrot.lane.b32.xlu1 %v1869_v62, %s1971_s20 }
 0x3a2   : > { %1446 = vrot.lane.b32.xlu0 %v2273_v61, %s1975_s29  ;;  %1885 = vrot.lane.b32.xlu1 %v1869_v62, %s1973_s22  ;;  %s269_s22 = sand.u32 1, %s1956_s25  }
 0x3a3   : > { %s1657_s23 = sshll.u32 %s269_s22, 3  ;;  %s1580_s9 = scalar_lea.sflag [#allocation3], %s269_s22 }
 0x3a6   : > { %982 = vperm.xlu0 %1867, %v979_v0   ;;  %1444 = vrot.lane.b32.xlu1 %v2278_v63, %s1975_s29  ;;  %s1718_s29 = sshll.u32 %s2039_s28, 7  ;;  %s1977_s28 = smov [#allocation2]  }
 0x3a7   : > { %s2415_s18 = scalar_lea.hbm %s2464_s7, %s1718_s29  ;;  %s1906_s14 = sshll.u32 %s1977_s28, 4  ;;  %s1907_s14 = int_to_ptr.vmem [resolvable:$false] %s1906_s14 }
 0x3a8   : > { %s1908_s19 = scalar_lea.vmem %s1907_s14, 256 }
 0x3aa   : > { %1895 = vrot.lane.b32.xlu1 %v1869_v62, %s1976_s8  ;;  %s271_s8 = scalar_lea.vmem [#allocation2], %s1657_s23 }
 0x3ab   : > { %s1594_s15 = sshll.u32 %s271_s8, 4  ;;  %s2417_s15 = int_to_ptr.vmem [resolvable:$true] %s1594_s15 }
 0x3ac   : > { %s1902_s13 = scalar_lea.vmem %s2417_s15, 128  ;;  %p1909_p0 = scmp.lt.s32.totalorder %s2417_s15, %s1907_s14 }
 0x3ad   : > { %p1903_p11 = scmp.ne.s32.totalorder %s2417_s15, %s1902_s13  ;;  %p1910_p1 = scmp.lt.s32.totalorder %s1908_s19, %s1902_s13 }
 0x3af   : > { %p1904_p12 = pnand %p1903_p11, %p2056_p5  ;;  %p1911_p2 = por %p1910_p1, %p1909_p0 }
 0x3b1   : > { %p1905_p13 = pneg %p1904_p12 }
 0x3b3   : > { %p1912_p3 = pnand %p1911_p2, %p1905_p13 }
 0x408   : > { %v1871_v3 = vpop.permute.xlu1 %1870  ;;  %v1063_v17 = vpop.permute.xlu0 %1062 }
 0x409   : > { %v1873_v6 = vunpack.i.h.bf16 %v1871_v3  ;;  %v1872_v8 = vunpack.i.l.bf16 %v1871_v3 }
 0x40b   : > { %v992_v9 = vsel %vm324_vm0, %v1872_v8, %v1873_v6  ;;  %v991_v11 = vsel %vm324_vm0, %v1840_v18, %v1872_v8  ;;  %v998_v18 = vpack.c.bf16 %v997_v7, %v997_v7 }
 0x40c   : > { %v1061_v12 = vpop.permute.xlu1 %1060  ;;  %v996_v14 = vsel %vm2123_vm2, %v992_v9, 0.0  ;;  %v995_v15 = vsel %vm2119_vm1, %v991_v11, 0.0  ;;  %v1881_v28 = vpop.permute.xlu0 %1880 }
 0x40d   : > { %v1000_v20 = vpack.c.bf16 %v996_v14, %v996_v14  ;;  %v999_v23 = vpack.c.bf16 %v995_v15, %v995_v15  ;;  %v1064_v24 = vsel %vm404_vm3, %v2113_v13, %v1061_v12  ;;  %v1065_v25 = vsel %vm404_vm3, %v1061_v12, %v1063_v17 }
 0x40e   : > { %v1070_v31 = vsel %vm339_vm4, %v1064_v24, 0  ;;  %v1883_v13 = vunpack.i.h.bf16 %v1881_v28  ;;  %v1882_v34 = vunpack.i.l.bf16 %v1881_v28 }
 0x40f   : > { %1686 = vmatprep.subr.msk.bf16.mxu1 %vm339_vm4, %v1000_v20  ;;  %v1005_v16 = vsel %vm339_vm4, %v999_v23, 0 }
 0x410   : > { %v1876_v5 = vpop.permute.xlu1 %1875  ;;  %1011 = vmatpush1.bf16.msra.mxu1 %v1005_v16  ;;  %v1190_v41 = vsel %vm537_vm9, %v1882_v34, %v1883_v13  ;;  %v1189_v47 = vsel %vm537_vm9, %v1850_v55, %v1882_v34  ;;  %v1694_v55 = vld [vmem:[%s2460_s3 + $0xc] sm:$0xf]  ;;  %v1891_v59 = vpop.permute.xlu0 %1890 }
 0x411   : > { %v1878_v26 = vunpack.i.h.bf16 %v1876_v5  ;;  %v1877_v27 = vunpack.i.l.bf16 %v1876_v5  ;;  %1689 = vmatprep.subr.msk.bf16.mxu1 %vm339_vm4, %v1065_v25  ;;  %v1194_v46 = vsel %vm2123_vm2, %v1190_v41, 0.0  ;;  %v1193_v50 = vsel %vm2119_vm1, %v1189_v47, 0.0 }
 0x412   : > { %v1198_v52 = vpack.c.bf16 %v1193_v50, %v1193_v50  ;;  %v1197_v10 = vpack.c.bf16 %v1694_v55, %v1694_v55  ;;  %v1892_v11 = vunpack.i.l.bf16 %v1891_v59 }
 0x413   : > { %v1123_v30 = vsel %vm467_vm6, %v1877_v27, %v1878_v26  ;;  %1687 = vmatmul.mubr.msk.bf16.vlgmr.msra.gmra.mrb[0].mxu1 %vm335_vm5, %v998_v18  ;;  %v1122_v35 = vsel %vm467_vm6, %v1845_v37, %v1877_v27  ;;  %v1199_v37 = vpack.c.bf16 %v1194_v46, %v1194_v46  ;;  %v1386_v26 = vpack.c.bf16 %v1703_v19, %v1703_v19 }
 0x414   : > { %v1127_v32 = vsel %vm2151_vm7, %v1123_v30, 0.0  ;;  %1076 = vmatpush1.bf16.msra.mxu1 %v1070_v31  ;;  %1107 = vmatprep.mubr.bf16.mxu1 %v1968_v2  ;;  %v1126_v39 = vsel %vm2157_vm8, %v1122_v35, 0.0  ;;  %v1886_v53 = vpop.permute.xlu1 %1885  ;;  %v1204_v54 = vsel %vm339_vm4, %v1198_v52, 0  ;;  %v1447_v23 = vpop.permute.xlu0 %1446  ;;  %v1709_v35 = vld [vmem:[%s2460_s3 + $0x20] sm:$0xf] }
 0x415   : > { %v1132_v33 = vpack.c.bf16 %v1127_v32, %v1127_v32  ;;  %v1131_v45 = vpack.c.bf16 %v1126_v39, %v1126_v39  ;;  %v1888_v38 = vunpack.i.h.bf16 %v1886_v53  ;;  %v1887_v58 = vunpack.i.l.bf16 %v1886_v53 }
 0x416   : > { %v1449_v18 = vsel %vm805_vm12, %v1447_v23, %v2231_v42  ;;  %v1514_v36 = vpack.c.bf16 %v1709_v35, %v1709_v35 }
 0x417   : > { %1692 = vmatprep.subr.msk.bf16.mxu1 %vm339_vm4, %v1132_v33  ;;  %v1137_v29 = vsel %vm339_vm4, %v1131_v45, 0  ;;  %v1312_v56 = vsel %vm662_vm10, %v1888_v38, %v2193_v4  ;;  %v1311_v0 = vsel %vm662_vm10, %v1887_v58, %v1888_v38  ;;  %v1697_v4 = vld [vmem:[%s2460_s3 + $0x10] sm:$0xf] }
 0x418   : > { %v1316_v57 = vsel %vm2151_vm7, %v1312_v56, 0.0  ;;  %v1315_v3 = vsel %vm2157_vm8, %v1311_v0, 0.0  ;;  %v1254_v63 = vpack.c.bf16 %v1697_v4, %v1697_v4  ;;  %v1445_v17 = vpop.permute.xlu1 %1444 }
 0x419   : > { %v1321_v62 = vpack.c.bf16 %v1316_v57, %v1316_v57  ;;  %v1320_v8 = vpack.c.bf16 %v1315_v3, %v1315_v3  ;;  %v1448_v27 = vsel %vm805_vm12, %v1445_v17, %v1447_v23 }
 0x41a   : > { %v1454_v30 = vsel %vm339_vm4, %v1448_v27, 0 }
 0x41b   : > { %v1326_v12 = vsel %vm339_vm4, %v1320_v8, 0 }
 0x41c   : > { %v1896_v16 = vpop.permute.xlu1 %1895 }
 0x41d   : > { %v1898_v24 = vunpack.i.h.bf16 %v1896_v16  ;;  %v1897_v42 = vunpack.i.l.bf16 %v1896_v16 }
 0x41f   : > { %1690 = vmatmul.mubr.msk.bf16.vlgmr.msra.gmra.mrb[0].mxu1 %vm335_vm5, %v1055_v44  ;;  %v1507_v25 = vsel %vm866_vm13, %v1898_v24, %v2238_v48  ;;  %v1506_v32 = vsel %vm866_vm13, %v1897_v42, %v1898_v24  ;;  %v1706_v48 = vld [vmem:[%s2460_s3 + $0x1c] sm:$0xf] }
 0x420   : > { %1143 = vmatpush1.bf16.msra.mxu1 %v1137_v29  ;;  %1174 = vmatprep.mubr.bf16.mxu1 %v1968_v2  ;;  %v1511_v28 = vsel %vm2151_vm7, %v1507_v25, 0.0  ;;  %v1510_v40 = vsel %vm2157_vm8, %v1506_v32, 0.0  ;;  %v1443_v33 = vpack.c.bf16 %v1706_v48, %v1706_v48 }
 0x421   : > { %1695 = vmatprep.subr.msk.bf16.mxu1 %vm339_vm4, %v1199_v37  ;;  %v1516_v31 = vpack.c.bf16 %v1511_v28, %v1511_v28  ;;  %v1515_v13 = vpack.c.bf16 %v1510_v40, %v1510_v40 }
 0x423   : > { %v1521_v34 = vsel %vm339_vm4, %v1515_v13, 0 }
 0x425   : > { %v983_v43 = vpop.permute.xlu0 %982 }
 0x42b   : > { %1693 = vmatmul.mubr.msk.bf16.vlgmr.msra.gmra.mrb[0].mxu1 %vm335_vm5, %v1130_v51 }
 0x42c   : > { %1210 = vmatpush1.bf16.msra.mxu1 %v1204_v54  ;;  %1241 = vmatprep.mubr.bf16.mxu1 %v1968_v2 }
 0x42d   : > { %1698 = vmatprep.subr.msk.bf16.mxu1 %vm339_vm4, %v2273_v61  ;;  %v1893_v61 = vunpack.i.h.bf16 %v1891_v59 }
 0x42f   : > { %v1379_v6 = vsel %vm732_vm11, %v1893_v61, %v2209_v22  ;;  %v1378_v15 = vsel %vm732_vm11, %v1892_v11, %v1893_v61  ;;  %v1700_v22 = vld [vmem:[%s2460_s3 + $0x14] sm:$0xf] }
 0x430   : > { %v1383_v9 = vsel %vm2123_vm2, %v1379_v6, 0.0  ;;  %v1382_v21 = vsel %vm2119_vm1, %v1378_v15, 0.0  ;;  %v1319_v7 = vpack.c.bf16 %v1700_v22, %v1700_v22 }
 0x431   : > { %v1388_v14 = vpack.c.bf16 %v1383_v9, %v1383_v9  ;;  %v1387_v20 = vpack.c.bf16 %v1382_v21, %v1382_v21 }
 0x433   : > { %v1393_v5 = vsel %vm339_vm4, %v1387_v20, 0 }
 0x437   : > { %1696 = vmatmul.mubr.msk.bf16.vlgmr.msra.gmra.mrb[0].mxu1 %vm335_vm5, %v1197_v10 }
 0x438   : > { %1265 = vmatpush1.bf16.msra.mxu1 %v1259_v60  ;;  %1296 = vmatprep.mubr.bf16.mxu1 %v1968_v2 }
 0x439   : > { %1701 = vmatprep.subr.msk.bf16.mxu1 %vm339_vm4, %v1321_v62 }
 0x443   : > { %1699 = vmatmul.mubr.msk.bf16.vlgmr.msra.gmra.mrb[0].mxu1 %vm335_vm5, %v1254_v63 }
 0x444   : > { %1332 = vmatpush1.bf16.msra.mxu1 %v1326_v12  ;;  %1363 = vmatprep.mubr.bf16.mxu1 %v1968_v2 }
 0x445   : > { %1704 = vmatprep.subr.msk.bf16.mxu1 %vm339_vm4, %v1388_v14 }
 0x44f   : > { %1702 = vmatmul.mubr.msk.bf16.vlgmr.msra.gmra.mrb[0].mxu1 %vm335_vm5, %v1319_v7 }
 0x450   : > { %1399 = vmatpush1.bf16.msra.mxu1 %v1393_v5  ;;  %1430 = vmatprep.mubr.bf16.mxu1 %v1968_v2 }
 0x451   : > { %1707 = vmatprep.subr.msk.bf16.mxu1 %vm339_vm4, %v1449_v18 }
 0x45b   : > { %1705 = vmatmul.mubr.msk.bf16.vlgmr.msra.gmra.mrb[0].mxu1 %vm335_vm5, %v1386_v26 }
 0x45c   : > { %1460 = vmatpush1.bf16.msra.mxu1 %v1454_v30  ;;  %1491 = vmatprep.mubr.bf16.mxu1 %v1968_v2 }
 0x45d   : > { %1710 = vmatprep.subr.msk.bf16.mxu1 %vm339_vm4, %v1516_v31 }
 0x467   : > { %1708 = vmatmul.mubr.msk.bf16.vlgmr.msra.gmra.mrb[0].mxu1 %vm335_vm5, %v1443_v33 }
 0x468   : > { %1527 = vmatpush1.bf16.msra.mxu1 %v1521_v34  ;;  %1558 = vmatprep.mubr.bf16.mxu1 %v1968_v2 }
 0x473   : > { %1711 = vmatmul.mubr.msk.bf16.vlgmr.msra.gmra.mrb[0].mxu1 %vm335_vm5, %v1514_v36 }
 0x546   : > { %v1560_v39 = vpop.f32.mrb[0].mxu1 }
 0x547   : > { %v1721_v41 = vadd.f32 %v1560_v39, %v983_v43  ;;  %v1562_v44 = vpop.f32.mrb[1].mxu1 }
 0x548   : > { %v1722_v45 = vadd.f32 %v1562_v44, %v983_v43  ;;  %v1564_v46 = vpop.f32.mrb[2].mxu1 }
 0x549   : > { %v1569_v29 = vmul.f32 0.2, %v1721_v41  ;;  %v1565_v37 = vpop.f32.mrb[3].mxu1 }
 0x54a   : > { %v1570_v2 = vmul.f32 0.2, %v1722_v45 }
 0x54b   : > { %v1571_v47 = vmax.f32 %v1721_v41, %v1569_v29 }
 0x54c   : > { %v1572_v49 = vmax.f32 %v1722_v45, %v1570_v2 }
 0x54e   : > { %v1575_v50 = vcombine.low %v1571_v47, %v1572_v49 }
 0x550   : > { %v1577_v51 = vadd.f32 %v1575_v50, %v2072_v1 }
 0x552   : > { %1578 = vst [vmem:[%s271_s8] sm:$0xff] %v1577_v51 }
 0x553   : > { %1915 = shalt.err (!%p1912_p3)
}
 0x554   : > { %s1916_s20 = scalar_lea.hbm %s2415_s18, 128  ;;  %s1920_s23 = scalar_lea.hbm %s2464_s7, 256 }
 0x555   : > { %p1917_p4 = scmp.ne.s32.totalorder %s2415_s18, %s1916_s20  ;;  %p1921_p9 = scmp.lt.u32.totalorder %s2415_s18, %s2464_s7 }
 0x556   : > { %p1922_p10 = scmp.lt.u32.totalorder %s1920_s23, %s1916_s20  ;;  %p1924_p12 = scmp.lt.u32.totalorder %s1916_s20, %s2415_s18 }
 0x557   : > { %p1918_p7 = pnand %p1917_p4, %p2056_p5 }
 0x558   : > { %p1923_p11 = por %p1922_p10, %p1921_p9 }
 0x559   : > { %p1919_p8 = pneg %p1918_p7 }
 0x55a   : > { %p1925_p13 = por %p1924_p12, %p1923_p11 }
 0x55c   : > { %p1926_p0 = pnand %p1925_p13, %p1919_p8 }
 0x55e   : > { %1929 = shalt.err (!%p1926_p0)
}
 0x55f   : > { %1787 = dma.vmem_to_hbm [thread:$0]  (%p2056_p5), %s2417_s15, 128, %s2415_s18, %s1580_s9  }
 0x560 PF: > { %p1793_p1 = scmp.ge.s32.totalorder %s1964_s27, 2  ;;  %s1606_s16 = sand.u32 1, %s1952_s24  }
 0x561   : > { %s1607_s17 = scalar_lea.sflag [#allocation3], %s1606_s16 }
 0x562   : > { %p1790_p2 = pnand %p1793_p1, %p2060_p6 }
 0x564   : > { %1947 = dma.done.wait (!%p1790_p2), %s1607_s17, 128  }
 0x565   : > { %1949 = vsyncadd (!%p1790_p2), %s1607_s17, 4294967168  ;;  %p17_p3 = scmp.ge.s32.totalorder %s2043_s30, 4   ;;  %s2475_s24 = smov %s1956_s25 }
 0x566   : > { %s2476_s25 = smov %s1960_s26  ;;  %s2477_s26 = smov %s2054_s10 }
 0x567   : > { %s2478_s27 = smov %s2043_s30  ;;  %19 = sbr.rel (!%p17_p3) target bundleno = 3 (0x3), region = 99 }
 0x56e   :  { %1612 = vsyncpa [#allocation3], 1 }
 0x56f   :  { %1614 = vsyncpa [#allocation3 + $0x1], 1 }

</bundles_post_ra>
